<compile_context>
chip_gen: v6e
topology: v6e:2x2x1
jax: 0.10.0
libtpu: 0.0.40
codegen_flags: <defaults>
</compile_context>

<pallas_src>
import math
import functools

import jax
import jax.numpy as jnp
from jax.experimental import pallas as pl
from jax.experimental.pallas import tpu as pltpu


def _round_up(x: int, m: int) -> int:
    return ((x + m - 1) // m) * m


# ----------------------------- Pallas kernel -------------------------------

def _fused_mlp_kernel(*refs, num_blocks: int):
    """Fused forward of all LinearBlocks.

    refs layout: (x_ref, w0_ref, b0_ref, w1_ref, b1_ref, ..., o_ref).
    Hidden activations live entirely in vregs/VMEM values; only the final
    (lane-dense, 128-wide) result slab is stored.
    """
    x_ref = refs[0]
    o_ref = refs[-1]
    wb_refs = refs[1:-1]

    h = x_ref[...]                       # no upfront f32 copy of the x tile
    for i in range(num_blocks):
        w_ref = wb_refs[2 * i]
        b_ref = wb_refs[2 * i + 1]
        # MXU matmul: operands in the weight dtype (bf16), f32 accumulation.
        h = jnp.dot(h.astype(w_ref.dtype), w_ref[...],
                    preferred_element_type=jnp.float32)
        # Epilogue (bias + ReLU) in f32 on the VPU.
        h = h + b_ref[...].astype(jnp.float32)
        if i < num_blocks - 1:           # last block: act='none'
            h = jnp.maximum(h, 0.0)
    o_ref[...] = h.astype(o_ref.dtype)   # single cast at the final store


# --------------------------------- Forward ---------------------------------

def mlp_forward(x_nchw, params, *, row_tile=512, compute_dtype=jnp.bfloat16):
    """x_nchw: (B, C, H, W) -> (B, nf_out).  norm='none', act='relu' blocks.

    params: list of (w, b) with w:(F_in, F_out) (PyTorch weight transposed),
            b:(F_out,).  Weights/biases may be f32; they are packed to the
            compute dtype (bf16) and lane-padded here.  In production this
            packing would happen once at parameter-load time.
    """
    B = x_nchw.shape[0]
    out_dtype = x_nchw.dtype
    x = x_nchw.reshape(B, -1)                      # x.view(x.size(0), -1)
    Fin = x.shape[1]
    num_blocks = len(params)
    nf_out = params[-1][0].shape[1]

    # ---- Lane-pad every feature dim to a multiple of 128 (lane-dense). ----
    Fin_p = _round_up(Fin, 128)
    if Fin_p != Fin:
        x = jnp.pad(x, ((0, 0), (0, Fin_p - Fin)))
    # Stream activations as bf16: halves x's HBM traffic (the kernel is
    # HBM-bound on reading x at these feature sizes).
    x = x.astype(compute_dtype)

    padded_params = []
    d_in = Fin_p
    for (w, b) in params:
        fi, fo = w.shape
        fo_p = _round_up(fo, 128)
        # Zero-padded weight columns/rows and zero-padded bias lanes keep the
        # real lanes exact (padded hidden lanes stay 0 through bias+ReLU).
        w_p = jnp.zeros((d_in, fo_p), compute_dtype).at[:fi, :fo].set(
            w.astype(compute_dtype))
        b_p = jnp.zeros((1, fo_p), jnp.float32).at[0, :fo].set(
            b.astype(jnp.float32))
        padded_params.append((w_p, b_p))
        d_in = fo_p
    Fout_p = d_in

    # ---- Row tiling. ----
    # Tiny batches: one tile equal to the full batch dim (allowed shape).
    # Otherwise: split into >= 2 tiles (both TensorCores on v7x), multiple of
    # 8 sublanes, capped at row_tile (=512) so double-buffered tiles stay well
    # under every generation's scoped-VMEM default (incl. v5e's 16 MiB).
    if B <= 8:
        tm = B
    else:
        tm = min(row_tile, max(8, _round_up(pl.cdiv(B, 2), 8)))
    grid = (pl.cdiv(B, tm),)

    in_specs = [pl.BlockSpec((tm, Fin_p), lambda i: (i, 0))]
    flat_inputs = [x]
    for (w_p, b_p) in padded_params:
        fi_p, fo_p = w_p.shape
        # Constant index_map -> weights/biases resident across batch tiles.
        in_specs.append(pl.BlockSpec((fi_p, fo_p), lambda i: (0, 0)))
        in_specs.append(pl.BlockSpec((1, fo_p), lambda i: (0, 0)))
        flat_inputs.append(w_p)
        flat_inputs.append(b_p)

    # Lane-dense (tm, 128) output slab; real columns sliced out afterwards.
    out_specs = pl.BlockSpec((tm, Fout_p), lambda i: (i, 0))

    flops = 2 * B * sum(w.shape[0] * w.shape[1] for (w, _) in padded_params)
    bytes_accessed = (
        x.size * jnp.dtype(compute_dtype).itemsize
        + sum(w.size * jnp.dtype(w.dtype).itemsize
              + b.size * jnp.dtype(b.dtype).itemsize
              for (w, b) in padded_params)
        + B * Fout_p * jnp.dtype(out_dtype).itemsize
    )
    cost = pl.CostEstimate(flops=flops, transcendentals=0,
                           bytes_accessed=bytes_accessed)

    kernel = functools.partial(_fused_mlp_kernel, num_blocks=num_blocks)
    out_padded = pl.pallas_call(
        kernel,
        out_shape=jax.ShapeDtypeStruct((B, Fout_p), out_dtype),
        grid=grid,
        in_specs=in_specs,
        out_specs=out_specs,
        compiler_params=pltpu.CompilerParams(
            dimension_semantics=("parallel",)),
        cost_estimate=cost,
    )(*flat_inputs)

    # TODO(synk): LinearBlock norm options ('bn'/'in') and use_sn (spectral
    # norm) are not exercised here; this implements the norm='none' path.
    return out_padded[:, :nf_out]


# ----------------------------- Parameter setup -----------------------------

def _torch_linear_init(key, fan_in, fan_out, dtype=jnp.float32):
    """Deterministic init matching torch.nn.Linear defaults.

    weight ~ U(-1/sqrt(fan_in), 1/sqrt(fan_in))   (kaiming_uniform a=sqrt(5))
    bias   ~ U(-1/sqrt(fan_in), 1/sqrt(fan_in))
    Returned weight is already transposed to (fan_in, fan_out) for the kernel.
    """
    kw, kb = jax.random.split(key)
    bound = 1.0 / math.sqrt(fan_in)
    w = jax.random.uniform(kw, (fan_in, fan_out), dtype, minval=-bound, maxval=bound)
    b = jax.random.uniform(kb, (fan_out,), dtype, minval=-bound, maxval=bound)
    return w, b


def make_mlp_params(key, nf_in, nf_out, nf_mlp, num_blocks):
    """nf_in->nf_mlp, (num_blocks-2) x nf_mlp->nf_mlp, nf_mlp->nf_out."""
    dims = [nf_in] + [nf_mlp] * (num_blocks - 1) + [nf_out]
    params = []
    for i in range(num_blocks):
        key, sub = jax.random.split(key)
        w, b = _torch_linear_init(sub, dims[i], dims[i + 1])
        params.append((w, b))
    return params


# ----------------------------------- Main -----------------------------------

if __name__ == "__main__":
    key = jax.random.PRNGKey(0)
    k_x, k_p = jax.random.split(key)

    # Small shapes consistent with the module: NCHW input flattened to nf_in.
    B, C, H, W = 2, 4, 16, 16
    nf_in = C * H * W          # 1024
    nf_mlp = 32
    nf_out = 8
    num_blocks = 3

    x = jax.random.normal(k_x, (B, C, H, W), dtype=jnp.float32)
    params = make_mlp_params(k_p, nf_in, nf_out, nf_mlp, num_blocks)

    out = mlp_forward(x, params)
    out = jax.block_until_ready(out)

    # sanity: shape check + reference check (bf16-operand / f32-accumulate
    # matmuls, matching the kernel's mixed precision).
    assert out.shape == (B, nf_out), out.shape
    h_ref = x.reshape(B, -1).astype(jnp.float32)
    for i, (w, b) in enumerate(params):
        h_ref = jnp.dot(h_ref.astype(jnp.bfloat16), w.astype(jnp.bfloat16),
                        preferred_element_type=jnp.float32) + b
        if i < len(params) - 1:
            h_ref = jnp.maximum(h_ref, 0.0)
    assert jnp.allclose(out.astype(jnp.float32), h_ref, atol=1e-2, rtol=1e-2), (
        jnp.max(jnp.abs(out.astype(jnp.float32) - h_ref)))

    print("KERNEL_OK")
</pallas_src>

<mosaic_0001>
module attributes {stable_mosaic.version = 11 : i64} {
  func.func @_fused_mlp_kernel(%arg0: i32, %arg1: memref<2x1024xbf16, #tpu.memory_space<vmem>>, %arg2: memref<1024x128xbf16, #tpu.memory_space<vmem>>, %arg3: memref<1x128xf32, #tpu.memory_space<vmem>>, %arg4: memref<128x128xbf16, #tpu.memory_space<vmem>>, %arg5: memref<1x128xf32, #tpu.memory_space<vmem>>, %arg6: memref<128x128xbf16, #tpu.memory_space<vmem>>, %arg7: memref<1x128xf32, #tpu.memory_space<vmem>>, %arg8: memref<2x128xf32, #tpu.memory_space<vmem>>) attributes {dimension_semantics = [#tpu.dimension_semantics<parallel>], iteration_bounds = array<i64: 1>, scalar_prefetch = 0 : i64, scratch_operands = 0 : i64, tpu.core_type = #tpu.core_type<tc>, window_params = [{transform_indices = @transform_0, window_bounds = array<i64: 2, 1024>}, {pipeline_mode = #tpu.pipeline_mode<synchronous>, transform_indices = @transform_1, window_bounds = array<i64: 1024, 128>}, {pipeline_mode = #tpu.pipeline_mode<synchronous>, transform_indices = @transform_2, window_bounds = array<i64: 1, 128>}, {pipeline_mode = #tpu.pipeline_mode<synchronous>, transform_indices = @transform_3, window_bounds = array<i64: 128, 128>}, {pipeline_mode = #tpu.pipeline_mode<synchronous>, transform_indices = @transform_4, window_bounds = array<i64: 1, 128>}, {pipeline_mode = #tpu.pipeline_mode<synchronous>, transform_indices = @transform_5, window_bounds = array<i64: 128, 128>}, {pipeline_mode = #tpu.pipeline_mode<synchronous>, transform_indices = @transform_6, window_bounds = array<i64: 1, 128>}, {transform_indices = @transform_7, window_bounds = array<i64: 2, 128>}]} {
    %c0 = arith.constant 0 : index
    %c0_0 = arith.constant 0 : index
    %0 = vector.load %arg1[%c0, %c0_0] : memref<2x1024xbf16, #tpu.memory_space<vmem>>, vector<2x1024xbf16>
    %c0_1 = arith.constant 0 : index
    %c0_2 = arith.constant 0 : index
    %1 = vector.load %arg2[%c0_1, %c0_2] : memref<1024x128xbf16, #tpu.memory_space<vmem>>, vector<1024x128xbf16>
    %cst = arith.constant dense<0.000000e+00> : vector<2x128xf32>
    %2 = tpu.matmul %0, %1, %cst {dimension_numbers = #tpu.dot_dimension_numbers<[1], [0], [0], [1], [0, 0, 1, 1], [], []>} : vector<2x1024xbf16>, vector<1024x128xbf16>, vector<2x128xf32> -> vector<2x128xf32>
    %c0_3 = arith.constant 0 : index
    %c0_4 = arith.constant 0 : index
    %3 = vector.load %arg3[%c0_3, %c0_4] : memref<1x128xf32, #tpu.memory_space<vmem>>, vector<1x128xf32>
    %4 = vector.broadcast %3 : vector<1x128xf32> to vector<2x128xf32>
    %5 = arith.addf %2, %4 : vector<2x128xf32>
    %cst_5 = arith.constant 0.000000e+00 : f32
    %6 = vector.broadcast %cst_5 : f32 to vector<2x128xf32>
    %7 = arith.maximumf %5, %6 : vector<2x128xf32>
    %8 = arith.truncf %7 : vector<2x128xf32> to vector<2x128xbf16>
    %c0_6 = arith.constant 0 : index
    %c0_7 = arith.constant 0 : index
    %9 = vector.load %arg4[%c0_6, %c0_7] : memref<128x128xbf16, #tpu.memory_space<vmem>>, vector<128x128xbf16>
    %cst_8 = arith.constant dense<0.000000e+00> : vector<2x128xf32>
    %10 = tpu.matmul %8, %9, %cst_8 {dimension_numbers = #tpu.dot_dimension_numbers<[1], [0], [0], [1], [0, 0, 1, 1], [], []>} : vector<2x128xbf16>, vector<128x128xbf16>, vector<2x128xf32> -> vector<2x128xf32>
    %c0_9 = arith.constant 0 : index
    %c0_10 = arith.constant 0 : index
    %11 = vector.load %arg5[%c0_9, %c0_10] : memref<1x128xf32, #tpu.memory_space<vmem>>, vector<1x128xf32>
    %12 = vector.broadcast %11 : vector<1x128xf32> to vector<2x128xf32>
    %13 = arith.addf %10, %12 : vector<2x128xf32>
    %cst_11 = arith.constant 0.000000e+00 : f32
    %14 = vector.broadcast %cst_11 : f32 to vector<2x128xf32>
    %15 = arith.maximumf %13, %14 : vector<2x128xf32>
    %16 = arith.truncf %15 : vector<2x128xf32> to vector<2x128xbf16>
    %c0_12 = arith.constant 0 : index
    %c0_13 = arith.constant 0 : index
    %17 = vector.load %arg6[%c0_12, %c0_13] : memref<128x128xbf16, #tpu.memory_space<vmem>>, vector<128x128xbf16>
    %cst_14 = arith.constant dense<0.000000e+00> : vector<2x128xf32>
    %18 = tpu.matmul %16, %17, %cst_14 {dimension_numbers = #tpu.dot_dimension_numbers<[1], [0], [0], [1], [0, 0, 1, 1], [], []>} : vector<2x128xbf16>, vector<128x128xbf16>, vector<2x128xf32> -> vector<2x128xf32>
    %c0_15 = arith.constant 0 : index
    %c0_16 = arith.constant 0 : index
    %19 = vector.load %arg7[%c0_15, %c0_16] : memref<1x128xf32, #tpu.memory_space<vmem>>, vector<1x128xf32>
    %20 = vector.broadcast %19 : vector<1x128xf32> to vector<2x128xf32>
    %21 = arith.addf %18, %20 : vector<2x128xf32>
    %c0_17 = arith.constant 0 : index
    %c0_18 = arith.constant 0 : index
    %22 = vector.load %arg8[%c0_17, %c0_18] : memref<2x128xf32, #tpu.memory_space<vmem>>, vector<2x128xf32>
    tpu.vector_store %arg8[%c0_17, %c0_18], %21 {strides = array<i32>} : memref<2x128xf32, #tpu.memory_space<vmem>>, vector<2x128xf32>,
    return
  }
  func.func @transform_0(%arg0: i32) -> (i32, i32) {
    %c0_i32 = arith.constant 0 : i32
    %c0_i32_0 = arith.constant 0 : i32
    return %arg0, %c0_i32 : i32, i32
  }
  func.func @transform_1(%arg0: i32) -> (i32, i32) {
    %c0_i32 = arith.constant 0 : i32
    %c0_i32_0 = arith.constant 0 : i32
    %c0_i32_1 = arith.constant 0 : i32
    return %c0_i32, %c0_i32_0 : i32, i32
  }
  func.func @transform_2(%arg0: i32) -> (i32, i32) {
    %c0_i32 = arith.constant 0 : i32
    %c0_i32_0 = arith.constant 0 : i32
    %c0_i32_1 = arith.constant 0 : i32
    return %c0_i32, %c0_i32_0 : i32, i32
  }
  func.func @transform_3(%arg0: i32) -> (i32, i32) {
    %c0_i32 = arith.constant 0 : i32
    %c0_i32_0 = arith.constant 0 : i32
    %c0_i32_1 = arith.constant 0 : i32
    return %c0_i32, %c0_i32_0 : i32, i32
  }
  func.func @transform_4(%arg0: i32) -> (i32, i32) {
    %c0_i32 = arith.constant 0 : i32
    %c0_i32_0 = arith.constant 0 : i32
    %c0_i32_1 = arith.constant 0 : i32
    return %c0_i32, %c0_i32_0 : i32, i32
  }
  func.func @transform_5(%arg0: i32) -> (i32, i32) {
    %c0_i32 = arith.constant 0 : i32
    %c0_i32_0 = arith.constant 0 : i32
    %c0_i32_1 = arith.constant 0 : i32
    return %c0_i32, %c0_i32_0 : i32, i32
  }
  func.func @transform_6(%arg0: i32) -> (i32, i32) {
    %c0_i32 = arith.constant 0 : i32
    %c0_i32_0 = arith.constant 0 : i32
    %c0_i32_1 = arith.constant 0 : i32
    return %c0_i32, %c0_i32_0 : i32, i32
  }
  func.func @transform_7(%arg0: i32) -> (i32, i32) {
    %c0_i32 = arith.constant 0 : i32
    %c0_i32_0 = arith.constant 0 : i32
    return %arg0, %c0_i32 : i32, i32
  }
}

</mosaic_0001>

<bundles_post_ra>
// kernel: tpu_custom_call.1
= control target key start
LH: loop header
LB: loop body
LE: loop exit
PB: predicated region body
PF: predicated region fallthrough
CT: control target
= control target key end

     0   :  { %12 = vsyncpa [#allocation3], 0  ;;  %s1605_s0 = inlined_call_operand.hbm [shape: bf16[2,1024], index: 0, kind: input, shape index: {}]   ;;  %s1606_s1 = inlined_call_operand.hbm [shape: bf16[1024,128], index: 1, kind: input, shape index: {}]   ;;  %s1607_s2 = inlined_call_operand.vmem [shape: f32[1,128], index: 2, kind: input, shape index: {}]   ;;  %s1608_s3 = inlined_call_operand.hbm [shape: bf16[128,128], index: 3, kind: input, shape index: {}]   ;;  %s1609_s4 = inlined_call_operand.vmem [shape: f32[1,128], index: 4, kind: input, shape index: {}]   ;;  %s1610_s5 = inlined_call_operand.hbm [shape: bf16[128,128], index: 5, kind: input, shape index: {}]   ;;  %s1611_s6 = inlined_call_operand.vmem [shape: f32[1,128], index: 6, kind: input, shape index: {}]   ;;  %s1612_s7 = inlined_call_operand.hbm [shape: f32[2,128], index: 7, kind: output, shape index: {}]  }
   0x1   :  { %13 = vsyncpa [#allocation6], 0 }
   0x2   :  { %14 = vsyncpa [#allocation9], 0 }
   0x3   :  { %15 = vsyncpa [#allocation4], 0  ;;  %s1491_s24 = smov [#allocation5]  }
   0x4   :  { %s31_s25 = sshll.u32 %s1491_s24, 4  ;;  %s32_s25 = int_to_ptr.vmem [resolvable:$true] %s31_s25 }
   0x5   :  { %s1391_s26 = scalar_lea.vmem %s32_s25, 8192  ;;  %p1396_p1 = scmp.lt.s32.totalorder %s32_s25, %s32_s25 }
   0x6   :  { %p1392_p0 = scmp.ne.s32.totalorder %s32_s25, %s1391_s26  ;;  %p1397_p2 = scmp.lt.s32.totalorder %s1391_s26, %s1391_s26 }
   0x8   :  { %p1398_p3 = por %p1397_p2, %p1396_p1 }
   0xa   :  { %p1399_p4 = pnand %p1398_p3, %p1392_p0 }
   0xc   :  { %1402 = shalt.err (!%p1399_p4)
}
   0xd   :  { %s1492_s27 = smov 64   ;;  %s1493_s28 = smov 4  }
   0xe   :  { %37 = dma.hbm_to_vmem [thread:$0]  %s1606_s1, 8192, %s32_s25, [#allocation6], %s1492_s27, %s1492_s27, %s1493_s28  }
   0xf   :  { %s1494_s8 = smov [#allocation2]   ;;  %s1495_s10 = smov [#allocation7]  }
  0x10   :  { %s22_s9 = sshll.u32 %s1494_s8, 4  ;;  %s45_s11 = sshll.u32 %s1495_s10, 4  ;;  %s23_s9 = int_to_ptr.vmem [resolvable:$true] %s22_s9  ;;  %s46_s11 = int_to_ptr.vmem [resolvable:$true] %s45_s11 }
  0x11   :  { %s1411_s12 = scalar_lea.vmem %s23_s9, 128  ;;  %p1416_p6 = scmp.lt.s32.totalorder %s23_s9, %s23_s9 }
  0x12   :  { %p1412_p5 = scmp.ne.s32.totalorder %s23_s9, %s1411_s12  ;;  %p1417_p7 = scmp.lt.s32.totalorder %s1411_s12, %s1411_s12 }
  0x14   :  { %p1418_p8 = por %p1417_p7, %p1416_p6 }
  0x16   :  { %p1419_p9 = pnand %p1418_p8, %p1412_p5 }
  0x18   :  { %1422 = shalt.err (!%p1419_p9)
}
  0x19   :  { %25 = dma.hbm_to_vmem [thread:$0]  %s1605_s0, 128, %s23_s9, [#allocation3]  }
  0x1a   :  { %s1431_s15 = scalar_lea.vmem %s46_s11, 1024  ;;  %p1436_p11 = scmp.lt.s32.totalorder %s46_s11, %s46_s11 }
  0x1b   :  { %p1432_p10 = scmp.ne.s32.totalorder %s46_s11, %s1431_s15  ;;  %p1437_p12 = scmp.lt.s32.totalorder %s1431_s15, %s1431_s15 }
  0x1d   :  { %p1438_p13 = por %p1437_p12, %p1436_p11 }
  0x1f   :  { %p1439_p0 = pnand %p1438_p13, %p1432_p10 }
  0x21   :  { %1442 = shalt.err (!%p1439_p0)
}
  0x22   :  { %51 = dma.hbm_to_vmem [thread:$0]  %s1608_s3, 1024, %s46_s11, [#allocation6], %s1492_s27, %s1492_s27, %s1493_s28  }
  0x23   :  { %s1496_s17 = smov [#allocation8]  }
  0x24   :  { %s59_s18 = sshll.u32 %s1496_s17, 4  ;;  %s60_s18 = int_to_ptr.vmem [resolvable:$true] %s59_s18 }
  0x25   :  { %s1451_s19 = scalar_lea.vmem %s60_s18, 1024  ;;  %p1456_p2 = scmp.lt.s32.totalorder %s60_s18, %s60_s18 }
  0x26   :  { %p1452_p1 = scmp.ne.s32.totalorder %s60_s18, %s1451_s19  ;;  %p1457_p3 = scmp.lt.s32.totalorder %s1451_s19, %s1451_s19 }
  0x28   :  { %p1458_p4 = por %p1457_p3, %p1456_p2 }
  0x2a   :  { %p1459_p5 = pnand %p1458_p4, %p1452_p1 }
  0x2c   :  { %1462 = shalt.err (!%p1459_p5)
}
  0x2d   :  { %65 = dma.hbm_to_vmem [thread:$0]  %s1610_s5, 1024, %s60_s18, [#allocation9], %s1492_s27, %s1492_s27, %s1493_s28  }
  0x2e   :  { %1483 = dma.done.wait [#allocation3], 128  }
  0x2f   :  { %1484 = vsyncadd [#allocation3], 4294967168 }
  0x30   :  { %1485 = dma.done.wait [#allocation6], 9216  }
  0x31   :  { %1486 = vsyncadd [#allocation6], 4294958080 }
  0x32   :  { %1487 = dma.done.wait [#allocation9], 1024  }
  0x33   :  { %1488 = vsyncadd [#allocation9], 4294966272  ;;  %v1302_v0 = vld [vmem:[#allocation5 + $0x78] sm:$0xff]   ;;  %v1306_v4 = vld [vmem:[#allocation5 + $0x70] sm:$0xff]   ;;  %v1497_v22 = vmov 1966171168   ;;  %v222_v24 = vlaneseq }
  0x34   :  { %v1303_v1 = vld [vmem:[#allocation5 + $0xf8] sm:$0xff]   ;;  %1146 = vmatprep.subr.bf16.mxu0 %v1302_v0  ;;  %v1307_v5 = vld [vmem:[#allocation5 + $0xf0] sm:$0xff]   ;;  %v1310_v8 = vld [vmem:[#allocation5 + $0x68] sm:$0xff]   ;;  %v220_v23 = vunpack.c.l.s4 %v1497_v22  ;;  %vm1499_vm0 = vmmov 0   ;;  %s1500_s24 = smov [#allocation10]  }
  0x35   :  { %v1304_v2 = vld [vmem:[#allocation5 + $0x38] sm:$0xff]   ;;  %1168 = vmatprep.subr.bf16.mxu1 %v1303_v1  ;;  %v1308_v6 = vld [vmem:[#allocation5 + $0x30] sm:$0xff]   ;;  %v1311_v9 = vld [vmem:[#allocation5 + $0xe8] sm:$0xff]   ;;  %v223_v30 = vshrl.u32 %v222_v24, 7  ;;  %s1052_s25 = sshll.u32 %s1500_s24, 4  ;;  %s1053_s25 = int_to_ptr.vmem [resolvable:$true] %s1052_s25 }
  0x36   :  { %v1305_v3 = vld [vmem:[#allocation5 + $0xb8] sm:$0xff]   ;;  %1147 = vmatpush3.bf16.msra.mxu0 %v1304_v2  ;;  %v1309_v7 = vld [vmem:[#allocation5 + $0xb0] sm:$0xff]   ;;  %v1312_v10 = vld [vmem:[#allocation5 + $0x28] sm:$0xff]   ;;  %v221_v29 = vunpack.c.0.s8 %v220_v23  ;;  %p1468_p7 = scmp.lt.s32.totalorder %s1053_s25, %s1053_s25 }
  0x37   :  { %1169 = vmatpush3.bf16.msra.mxu1 %v1305_v3  ;;  %1148 = vmatprep.subr.bf16.mxu0 %v1306_v4  ;;  %v1313_v11 = vld [vmem:[#allocation5 + $0xa8] sm:$0xff]   ;;  %v1314_v12 = vld [vmem:[#allocation5 + $0x60] sm:$0xff]   ;;  %v1318_v16 = vld [vmem:[#allocation5 + $0x58] sm:$0xff]  }
  0x38   :  { %1170 = vmatprep.subr.bf16.mxu1 %v1307_v5  ;;  %v1315_v13 = vld [vmem:[#allocation5 + $0xe0] sm:$0xff]   ;;  %v1319_v17 = vld [vmem:[#allocation5 + $0xd8] sm:$0xff]   ;;  %v1322_v20 = vld [vmem:[#allocation5 + $0x50] sm:$0xff]   ;;  %v1562_v35 = vsub.s32 %v221_v29, %v223_v30 }
  0x39   :  { %v1316_v14 = vld [vmem:[#allocation5 + $0x20] sm:$0xff]   ;;  %v1320_v18 = vld [vmem:[#allocation5 + $0x18] sm:$0xff]   ;;  %v1323_v21 = vld [vmem:[#allocation5 + $0xd0] sm:$0xff]  }
  0x3a   :  { %1149 = vmatpush3.bf16.msra.mxu0 %v1308_v6  ;;  %v1317_v15 = vld [vmem:[#allocation5 + $0xa0] sm:$0xff]   ;;  %v1321_v19 = vld [vmem:[#allocation5 + $0x98] sm:$0xff]   ;;  %v1324_v25 = vld [vmem:[#allocation5 + $0x10] sm:$0xff]  }
  0x3b   :  { %1171 = vmatpush3.bf16.msra.mxu1 %v1309_v7  ;;  %1150 = vmatprep.subr.bf16.mxu0 %v1310_v8  ;;  %v1325_v26 = vld [vmem:[#allocation5 + $0x90] sm:$0xff]   ;;  %v1326_v27 = vld [vmem:[#allocation5 + $0x48] sm:$0xff]   ;;  %v1330_v33 = vld [vmem:[#allocation5 + $0x40] sm:$0xff]  }
  0x3c   :  { %1172 = vmatprep.subr.bf16.mxu1 %v1311_v9  ;;  %v1327_v28 = vld [vmem:[#allocation5 + $0xc8] sm:$0xff]   ;;  %v1331_v34 = vld [vmem:[#allocation5 + $0xc0] sm:$0xff]   ;;  %v81_v38 = vld [vmem:[#allocation2] sm:$0xff] }
  0x3d   :  { %v1328_v31 = vld [vmem:[#allocation5 + $0x8] sm:$0xff]   ;;  %v1332_v36 = vld [vmem:[#allocation5] sm:$0xff]   ;;  %v218_v39 = vcombine.high %v81_v38, %v81_v38  ;;  %v225_v40 = vrot.slane %v81_v38, %v1562_v35  ;;  %v1335_v41 = vld [vmem:[#allocation5 + $0x178] sm:$0xff]  }
  0x3e   :  { %1151 = vmatpush3.bf16.msra.mxu0 %v1312_v10  ;;  %v1329_v32 = vld [vmem:[#allocation5 + $0x88] sm:$0xff]   ;;  %v1333_v37 = vld [vmem:[#allocation5 + $0x80] sm:$0xff]   ;;  %v1336_v42 = vld [vmem:[#allocation5 + $0x1f8] sm:$0xff]  }
  0x3f   :  { %1173 = vmatpush3.bf16.msra.mxu1 %v1313_v11  ;;  %1152 = vmatprep.subr.bf16.mxu0 %v1314_v12  ;;  %v233_v43 = vcombine.high %v225_v40, %v225_v40  ;;  %v241_v44 = vrot.slane %v225_v40, %v1562_v35  ;;  %v1567_v45 = vrot.slane %v218_v39, %v1562_v35  ;;  %v1337_v46 = vld [vmem:[#allocation5 + $0x138] sm:$0xff]   ;;  %v1339_v51 = vld [vmem:[#allocation5 + $0x170] sm:$0xff]   ;;  %v1343_v58 = vld [vmem:[#allocation5 + $0x168] sm:$0xff]  }
  0x40   :  { %1174 = vmatprep.subr.bf16.mxu1 %v1315_v13  ;;  %v1338_v48 = vld [vmem:[#allocation5 + $0x1b8] sm:$0xff]   ;;  %v1340_v53 = vld [vmem:[#allocation5 + $0x1f0] sm:$0xff]   ;;  %v1344_v59 = vld [vmem:[#allocation5 + $0x1e8] sm:$0xff]  }
  0x41   :  { %v255_v47 = vrot.slane %v233_v43, %v1562_v35  ;;  %v234_v49 = vcombine.high %v1567_v45, %v1567_v45  ;;  %v263_v50 = vcombine.high %v241_v44, %v241_v44  ;;  %v1341_v55 = vld [vmem:[#allocation5 + $0x130] sm:$0xff]   ;;  %v1345_v60 = vld [vmem:[#allocation5 + $0x128] sm:$0xff]   ;;  %v1347_v62 = vld [vmem:[#allocation5 + $0x160] sm:$0xff]  }
  0x42   :  { %1153 = vmatpush3.bf16.msra.mxu0 %v1316_v14  ;;  %v1342_v56 = vld [vmem:[#allocation5 + $0x1b0] sm:$0xff]   ;;  %v1346_v61 = vld [vmem:[#allocation5 + $0x1a8] sm:$0xff]   ;;  %v1348_v63 = vld [vmem:[#allocation5 + $0x1e0] sm:$0xff]  }
  0x43   :  { %1175 = vmatpush3.bf16.msra.mxu1 %v1317_v15  ;;  %1154 = vmatprep.subr.bf16.mxu0 %v1318_v16  ;;  %v265_v52 = vcombine.high %v255_v47, %v255_v47  ;;  %v262_v54 = vrot.slane %v234_v49, %v1562_v35  ;;  %v1349_v0 = vld [vmem:[#allocation5 + $0x120] sm:$0xff]   ;;  %v1351_v2 = vld [vmem:[#allocation5 + $0x158] sm:$0xff]   ;;  %v1355_v6 = vld [vmem:[#allocation5 + $0x150] sm:$0xff]  }
  0x44   :  { %1176 = vmatprep.subr.bf16.mxu1 %v1319_v17  ;;  %691 = vmatprep.mubr.bf16.mxu0 %v255_v47  ;;  %v1350_v1 = vld [vmem:[#allocation5 + $0x1a0] sm:$0xff]   ;;  %v1352_v3 = vld [vmem:[#allocation5 + $0x1d8] sm:$0xff]   ;;  %v1356_v7 = vld [vmem:[#allocation5 + $0x1d0] sm:$0xff]  }
  0x45   :  { %731 = vmatprep.mubr.bf16.mxu1 %v265_v52  ;;  %v266_v57 = vcombine.high %v262_v54, %v262_v54  ;;  %v1353_v4 = vld [vmem:[#allocation5 + $0x118] sm:$0xff]   ;;  %v1357_v8 = vld [vmem:[#allocation5 + $0x110] sm:$0xff]   ;;  %v1359_v10 = vld [vmem:[#allocation5 + $0x148] sm:$0xff]  }
  0x46   :  { %1155 = vmatpush3.bf16.msra.mxu0 %v1320_v18  ;;  %v1354_v5 = vld [vmem:[#allocation5 + $0x198] sm:$0xff]   ;;  %v1358_v9 = vld [vmem:[#allocation5 + $0x190] sm:$0xff]   ;;  %v1360_v11 = vld [vmem:[#allocation5 + $0x1c8] sm:$0xff]   ;;  %v248_v18 = vrot.slane %v1567_v45, %v1562_v35 }
  0x47   :  { %1177 = vmatpush3.bf16.msra.mxu1 %v1321_v19  ;;  %1156 = vmatprep.subr.bf16.mxu0 %v1322_v20  ;;  %v1361_v12 = vld [vmem:[#allocation5 + $0x108] sm:$0xff]   ;;  %v1363_v14 = vld [vmem:[#allocation5 + $0x140] sm:$0xff]   ;;  %v1367_v20 = vld [vmem:[#allocation7 + $0x38] sm:$0xff]  }
  0x48   :  { %1178 = vmatprep.subr.bf16.mxu1 %v1323_v21  ;;  %v1362_v13 = vld [vmem:[#allocation5 + $0x188] sm:$0xff]   ;;  %v1364_v15 = vld [vmem:[#allocation5 + $0x1c0] sm:$0xff]   ;;  %v264_v19 = vcombine.high %v248_v18, %v248_v18  ;;  %v1498_v21 = vmov 0.0   ;;  %v1368_v22 = vld [vmem:[#allocation7 + $0x30] sm:$0xff]  }
  0x49   :  { %v1365_v16 = vld [vmem:[#allocation5 + $0x100] sm:$0xff]   ;;  %v1369_v23 = vld [vmem:[#allocation7 + $0x28] sm:$0xff]   ;;  %v1375_v29 = vld [vmem:[#allocation8 + $0x38] sm:$0xff]  }
  0x4a   :  { %1157 = vmatpush3.bf16.msra.mxu0 %v1324_v25  ;;  %v1366_v17 = vld [vmem:[#allocation5 + $0x180] sm:$0xff]   ;;  %v1371_v25 = vld [vmem:[#allocation7 + $0x18] sm:$0xff]   ;;  %v1376_v30 = vld [vmem:[#allocation8 + $0x30] sm:$0xff]  }
  0x4b   :  { %1179 = vmatpush3.bf16.msra.mxu1 %v1325_v26  ;;  %1158 = vmatprep.subr.bf16.mxu0 %v1326_v27  ;;  %v1370_v24 = vld [vmem:[#allocation7 + $0x20] sm:$0xff]   ;;  %v1372_v26 = vld [vmem:[#allocation7 + $0x10] sm:$0xff]   ;;  %v1373_v27 = vld [vmem:[#allocation7 + $0x8] sm:$0xff]  }
  0x4c   :  { %1180 = vmatprep.subr.bf16.mxu1 %v1327_v28  ;;  %v1374_v28 = vld [vmem:[#allocation7] sm:$0xff]  }
  0x4e   :  { %1159 = vmatpush3.bf16.msra.mxu0 %v1328_v31  ;;  %v1377_v31 = vld [vmem:[#allocation8 + $0x28] sm:$0xff]  }
  0x4f   :  { %1181 = vmatpush3.bf16.msra.mxu1 %v1329_v32  ;;  %1160 = vmatprep.subr.bf16.mxu0 %v1330_v33  ;;  %v1378_v32 = vld [vmem:[#allocation8 + $0x20] sm:$0xff]   ;;  %v1379_v33 = vld [vmem:[#allocation8 + $0x18] sm:$0xff]  }
  0x50   :  { %1182 = vmatprep.subr.bf16.mxu1 %v1331_v34  ;;  %v1380_v34 = vld [vmem:[#allocation8 + $0x10] sm:$0xff]  }
  0x52   :  { %1161 = vmatpush3.bf16.msra.mxu0 %v1332_v36 }
  0x53   :  { %1183 = vmatpush3.bf16.msra.mxu1 %v1333_v37  ;;  %1190 = vmatprep.subr.bf16.mxu0 %v1335_v41 }
  0x54   :  { %1212 = vmatprep.subr.bf16.mxu1 %v1336_v42 }
  0x55   :  { %692 = vmatmul.mubr.bf16.vlgmr.msra.gmra.mxu0 %v241_v44  ;;  %v1063_v44 = vld [vmem:[%s1607_s2] ss:$0 sm:$0xff] }
  0x56   :  { %1191 = vmatpush3.bf16.msra.mxu0 %v1337_v46  ;;  %732 = vmatmul.mubr.bf16.vlgmr.msra.gmra.mxu1 %v263_v50 }
  0x57   :  { %1192 = vmatprep.subr.bf16.mxu0 %v1339_v51  ;;  %1213 = vmatpush3.bf16.msra.mxu1 %v1338_v48 }
  0x58   :  { %771 = vmatprep.mubr.bf16.mxu0 %v262_v54  ;;  %1214 = vmatprep.subr.bf16.mxu1 %v1340_v53 }
  0x59   :  { %811 = vmatprep.mubr.bf16.mxu1 %v266_v57 }
  0x5a   :  { %1193 = vmatpush3.bf16.msra.mxu0 %v1341_v55 }
  0x5b   :  { %1194 = vmatprep.subr.bf16.mxu0 %v1343_v58  ;;  %1215 = vmatpush3.bf16.msra.mxu1 %v1342_v56 }
  0x5c   :  { %1216 = vmatprep.subr.bf16.mxu1 %v1344_v59 }
  0x5e   :  { %1195 = vmatpush3.bf16.msra.mxu0 %v1345_v60 }
  0x5f   :  { %1196 = vmatprep.subr.bf16.mxu0 %v1347_v62  ;;  %1217 = vmatpush3.bf16.msra.mxu1 %v1346_v61  ;;  %v1381_v62 = vld [vmem:[#allocation8 + $0x8] sm:$0xff]  }
  0x60   :  { %1218 = vmatprep.subr.bf16.mxu1 %v1348_v63  ;;  %v1382_v63 = vld [vmem:[#allocation8] sm:$0xff]  }
  0x62   :  { %1197 = vmatpush3.bf16.msra.mxu0 %v1349_v0  ;;  %v1128_v0 = vld [vmem:[%s1609_s4] ss:$0 sm:$0xff]  ;;  %s1463_s4 = scalar_lea.vmem %s1053_s25, 32 }
  0x63   :  { %1198 = vmatprep.subr.bf16.mxu0 %v1351_v2  ;;  %1219 = vmatpush3.bf16.msra.mxu1 %v1350_v1  ;;  %p1464_p6 = scmp.ne.s32.totalorder %s1053_s25, %s1463_s4  ;;  %p1469_p8 = scmp.lt.s32.totalorder %s1463_s4, %s1463_s4 }
  0x64   :  { %1220 = vmatprep.subr.bf16.mxu1 %v1352_v3 }
  0x65   :  { %p1470_p9 = por %p1469_p8, %p1468_p7 }
  0x66   :  { %1199 = vmatpush3.bf16.msra.mxu0 %v1353_v4 }
  0x67   :  { %1200 = vmatprep.subr.bf16.mxu0 %v1355_v6  ;;  %1221 = vmatpush3.bf16.msra.mxu1 %v1354_v5  ;;  %p1471_p10 = pnand %p1470_p9, %p1464_p6 }
  0x68   :  { %1222 = vmatprep.subr.bf16.mxu1 %v1356_v7 }
  0x6a   :  { %1201 = vmatpush3.bf16.msra.mxu0 %v1357_v8  ;;  %v1137_v8 = vld [vmem:[%s1611_s6] ss:$0 sm:$0xff] }
  0x6b   :  { %1202 = vmatprep.subr.bf16.mxu0 %v1359_v10  ;;  %1223 = vmatpush3.bf16.msra.mxu1 %v1358_v9 }
  0x6c   :  { %1224 = vmatprep.subr.bf16.mxu1 %v1360_v11 }
  0x6e   :  { %1203 = vmatpush3.bf16.msra.mxu0 %v1361_v12 }
  0x6f   :  { %1204 = vmatprep.subr.bf16.mxu0 %v1363_v14  ;;  %1225 = vmatpush3.bf16.msra.mxu1 %v1362_v13 }
  0x70   :  { %1226 = vmatprep.subr.bf16.mxu1 %v1364_v15 }
  0x72   :  { %1205 = vmatpush3.bf16.msra.mxu0 %v1365_v16 }
  0x73   :  { %1227 = vmatpush3.bf16.msra.mxu1 %v1366_v17  ;;  %1252 = vmatprep.subr.bf16.mxu0 %v1498_v21 }
  0x74   :  { %1272 = vmatprep.subr.bf16.mxu1 %v1498_v21 }
  0x75   :  { %772 = vmatmul.mubr.bf16.vlgmr.msra.gmra.mxu0 %v248_v18 }
  0x76   :  { %812 = vmatmul.mubr.bf16.vlgmr.msra.gmra.mxu1 %v264_v19  ;;  %1253 = vmatpush3.bf16.msra.mxu0 %v1367_v20 }
  0x77   :  { %1254 = vmatprep.subr.bf16.mxu0 %v1498_v21  ;;  %1268 = vmatprep.mubr.msk.bf16.mxu0 %vm1499_vm0, %v1498_v21 }
  0x78   :  { %1288 = vmatprep.mubr.msk.bf16.mxu1 %vm1499_vm0, %v1498_v21  ;;  %1273 = vmatpush3.bf16.msra.mxu1 %v1375_v29 }
  0x79   :  { %1274 = vmatprep.subr.bf16.mxu1 %v1498_v21 }
  0x7a   :  { %1255 = vmatpush3.bf16.msra.mxu0 %v1368_v22 }
  0x7b   :  { %1256 = vmatprep.subr.bf16.mxu0 %v1498_v21 }
  0x7c   :  { %1275 = vmatpush3.bf16.msra.mxu1 %v1376_v30 }
  0x7d   :  { %1276 = vmatprep.subr.bf16.mxu1 %v1498_v21 }
  0x7e   :  { %1257 = vmatpush3.bf16.msra.mxu0 %v1369_v23 }
  0x7f   :  { %1258 = vmatprep.subr.bf16.mxu0 %v1498_v21 }
  0x80   :  { %1277 = vmatpush3.bf16.msra.mxu1 %v1377_v31 }
  0x81   :  { %1278 = vmatprep.subr.bf16.mxu1 %v1498_v21 }
  0x82   :  { %1259 = vmatpush3.bf16.msra.mxu0 %v1370_v24 }
  0x83   :  { %1260 = vmatprep.subr.bf16.mxu0 %v1498_v21 }
  0x84   :  { %1279 = vmatpush3.bf16.msra.mxu1 %v1378_v32 }
  0x85   :  { %1280 = vmatprep.subr.bf16.mxu1 %v1498_v21 }
  0x86   :  { %1261 = vmatpush3.bf16.msra.mxu0 %v1371_v25 }
  0x87   :  { %1262 = vmatprep.subr.bf16.mxu0 %v1498_v21 }
  0x88   :  { %1281 = vmatpush3.bf16.msra.mxu1 %v1379_v33 }
  0x89   :  { %1282 = vmatprep.subr.bf16.mxu1 %v1498_v21 }
  0x8a   :  { %1263 = vmatpush3.bf16.msra.mxu0 %v1372_v26 }
  0x8b   :  { %1264 = vmatprep.subr.bf16.mxu0 %v1498_v21 }
  0x8c   :  { %1283 = vmatpush3.bf16.msra.mxu1 %v1380_v34 }
  0x8d   :  { %1284 = vmatprep.subr.bf16.mxu1 %v1498_v21 }
  0x8e   :  { %1265 = vmatpush3.bf16.msra.mxu0 %v1373_v27 }
  0x8f   :  { %1266 = vmatprep.subr.bf16.mxu0 %v1498_v21 }
  0x90   :  { %1285 = vmatpush3.bf16.msra.mxu1 %v1381_v62 }
  0x91   :  { %1286 = vmatprep.subr.bf16.mxu1 %v1498_v21 }
  0x92   :  { %1267 = vmatpush3.bf16.msra.mxu0 %v1374_v28 }
  0x94   :  { %1287 = vmatpush3.bf16.msra.mxu1 %v1382_v63 }
 0x115   :  { %v1162_v35 = vpop.f32.mrf.mxu0 }
 0x116   :  { %v1184_v36 = vpop.f32.mrf.mxu1 }
 0x117   :  { %v1163_v37 = vpop.f32.mrf.mxu0 }
 0x118   :  { %v1185_v38 = vpop.f32.mrf.mxu1  ;;  %v1164_v43 = vadd.f32 %v1163_v37, %v1162_v35 }
 0x119   :  { %v1165_v39 = vpop.f32.mrf.mxu0  ;;  %v1186_v46 = vadd.f32 %v1185_v38, %v1184_v36 }
 0x11a   :  { %v1187_v40 = vpop.f32.mrf.mxu1  ;;  %v694_v45 = vadd.f32 %v1164_v43, %v1063_v44 }
 0x11b   :  { %v1166_v41 = vpop.f32.mrf.mxu0 }
 0x11c   :  { %v1188_v42 = vpop.f32.mrf.mxu1  ;;  %v734_v50 = vadd.f32 %v1186_v46, %v694_v45 }
 0x135   :  { %v1206_v47 = vpop.f32.mrf.mxu0 }
 0x136   :  { %v1228_v48 = vpop.f32.mrf.mxu1 }
 0x137   :  { %v1207_v49 = vpop.f32.mrf.mxu0 }
 0x138   :  { %v1208_v51 = vadd.f32 %v1207_v49, %v1206_v47  ;;  %v1229_v52 = vpop.f32.mrf.mxu1 }
 0x139   :  { %v1209_v53 = vpop.f32.mrf.mxu0  ;;  %v1230_v55 = vadd.f32 %v1229_v52, %v1228_v48 }
 0x13a   :  { %v774_v54 = vadd.f32 %v1208_v51, %v734_v50  ;;  %v1231_v56 = vpop.f32.mrf.mxu1 }
 0x13b   :  { %v1210_v57 = vpop.f32.mrf.mxu0 }
 0x13c   :  { %v814_v58 = vadd.f32 %v1230_v55, %v774_v54  ;;  %v1232_v59 = vpop.f32.mrf.mxu1 }
 0x13e   :  { %v819_v60 = vmax.f32 %v814_v58, 0.0 }
 0x140   :  { %v820_v61 = vpack.c.bf16 %v819_v60, %v819_v60 }
 0x142   :  { %1269 = vmatmul.mubr.bf16.vlgmr.msra.gmra.mxu0 %v820_v61 }
 0x202   :  { %v926_v1 = vpop.f32.mrf.mxu0 }
 0x203   :  { %v927_v2 = vadd.f32 %v1128_v0, %v926_v1 }
 0x204   :  { %v1270_v3 = vpop.f32.mrf.mxu0 }
 0x205   :  { %v932_v4 = vmax.f32 %v927_v2, 0.0 }
 0x206   :  { %v929_v5 = vpop.f32.mrf.mxu0 }
 0x207   :  { %v933_v6 = vpack.c.bf16 %v932_v4, %v932_v4 }
 0x208   :  { %v1271_v7 = vpop.f32.mrf.mxu0 }
 0x209   :  { %1289 = vmatmul.mubr.bf16.vlgmr.msra.gmra.mxu1 %v933_v6 }
 0x2c9   :  { %v1039_v9 = vpop.f32.mrf.mxu1 }
 0x2ca   :  { %v1040_v10 = vadd.f32 %v1137_v8, %v1039_v9 }
 0x2cb   :  { %v1290_v11 = vpop.f32.mrf.mxu1 }
 0x2cc   :  { %1045 = vst [vmem:[#allocation10] sm:$0x3] %v1040_v10 }
 0x2cd   :  { %v1042_v12 = vpop.f32.mrf.mxu1 }
 0x2ce   :  { %1474 = shalt.err (!%p1471_p10)
}
 0x2cf   :  { %1055 = dma.vmem_to_hbm [thread:$0]  %s1053_s25, 32, %s1612_s7, [#allocation4]   ;;  %v1291_v13 = vpop.f32.mrf.mxu1 }
 0x2d0   :  { %1489 = dma.done.wait [#allocation4], 32  }
 0x2d1   :  { %1490 = vsyncadd [#allocation4], 4294967264 }
 0x2d2   :  { %1059 = vsyncpa [#allocation3], 1 }
 0x2d3   :  { %1060 = vsyncpa [#allocation6], 1 }
 0x2d4   :  { %1061 = vsyncpa [#allocation9], 1 }
 0x2d5   :  { %1062 = vsyncpa [#allocation4], 1 }

</bundles_post_ra>
